<compile_context>
chip_gen: v5e
topology: v5e:2x2
jax: 0.10.0
libtpu: 0.0.40
codegen_flags: <defaults>
</compile_context>

<pallas_src>
import math
import functools

import jax
import jax.numpy as jnp
from jax.experimental import pallas as pl
from jax.experimental.pallas import tpu as pltpu


def gcn_kernel(a_ref, h_ref, inv_in_ref, wt_ref, b_ref, o_ref, acc_ref):
    # a_ref:      (tm, tk)          bf16 adjacency tile (dst rows x src cols)
    # h_ref:      (tk, F_in)        pre-normalised source features (feat/out_norm)
    # inv_in_ref: (tm, 1)           1 / in_norm for this tile of destination nodes
    # wt_ref:     (F_in, F_out_pad) pre-transposed, lane-padded weight
    # b_ref:      (1,  F_out_pad)   lane-padded bias
    # o_ref:      (tm, F_out_pad)   output tile
    # acc_ref:    (tm, F_in)        f32 accumulator scratch (neighbor sum)
    k = pl.program_id(1)

    @pl.when(k == 0)
    def _():
        acc_ref[...] = jnp.zeros_like(acc_ref)

    # Neighbor sum: bf16 adjacency is exact for 0/1; widen to f32 so the
    # accumulation matches the f32 reference exactly.
    acc_ref[...] += jnp.dot(a_ref[...].astype(jnp.float32), h_ref[...],
                            preferred_element_type=jnp.float32)

    @pl.when(k == pl.num_programs(1) - 1)
    def _():
        h2 = acc_ref[...] * inv_in_ref[...]            # multiply by 1/in_norm
        out = jnp.dot(h2, wt_ref[...],
                      preferred_element_type=jnp.float32) + b_ref[...]
        o_ref[...] = out.astype(o_ref.dtype)


@functools.partial(jax.jit, static_argnames=("tm", "tk"))
def gcn_layer(adj, feat, in_norm, out_norm, weight, bias, *, tm=128, tk=128):
    N, f_in = feat.shape
    f_out = weight.shape[0]

    # ---- grid-invariant prep hoisted out of the kernel ----------------------
    h = feat * (1.0 / out_norm)[:, None]               # feat / out_norm, once
    inv_in = (1.0 / in_norm).reshape(N, 1)             # reciprocal, once

    # Pre-transposed weight, output dim padded to a lane-dense multiple of 128.
    f_out_pad = max(128, ((f_out + 127) // 128) * 128)
    wt = jnp.zeros((f_in, f_out_pad), jnp.float32).at[:, :f_out].set(
        weight.T.astype(jnp.float32))
    b2 = jnp.zeros((1, f_out_pad), jnp.float32).at[:, :f_out].set(
        bias.astype(jnp.float32))

    # Pad node counts to full tiles (rows -> tm, contraction -> tk).
    n_m = pl.cdiv(N, tm) * tm
    n_k = pl.cdiv(N, tk) * tk

    adj_p = jnp.zeros((n_m, n_k), jnp.bfloat16).at[:N, :N].set(
        adj.astype(jnp.bfloat16))                       # 0/1 exact in bf16
    h_p = jnp.zeros((n_k, f_in), jnp.float32).at[:N, :].set(h)
    inv_in_p = jnp.ones((n_m, 1), jnp.float32).at[:N, :].set(inv_in)

    grid = (n_m // tm, n_k // tk)                       # (row tiles, K tiles)

    out_padded = pl.pallas_call(
        gcn_kernel,
        out_shape=jax.ShapeDtypeStruct((n_m, f_out_pad), jnp.float32),
        grid_spec=pltpu.PrefetchScalarGridSpec(
            num_scalar_prefetch=0,
            grid=grid,
            in_specs=[
                pl.BlockSpec((tm, tk), lambda i, k: (i, k)),            # A tile
                pl.BlockSpec((tk, f_in), lambda i, k: (k, 0)),          # h tile
                pl.BlockSpec((tm, 1), lambda i, k: (i, 0)),             # 1/in_norm
                pl.BlockSpec((f_in, f_out_pad), lambda i, k: (0, 0)),   # W^T
                pl.BlockSpec((1, f_out_pad), lambda i, k: (0, 0)),      # bias
            ],
            out_specs=pl.BlockSpec((tm, f_out_pad), lambda i, k: (i, 0)),
            scratch_shapes=[pltpu.VMEM((tm, f_in), jnp.float32)],
        ),
        compiler_params=pltpu.CompilerParams(
            dimension_semantics=("parallel", "arbitrary"),
            vmem_limit_bytes=48 * 1024 * 1024,          # fits v7x 64 MiB w/ headroom
        ),
    )(adj_p, h_p, inv_in_p, wt, b2)

    return out_padded[:N, :f_out].astype(feat.dtype)


def gcn_layer_ref(adj, feat, in_norm, out_norm, weight, bias):
    h = feat / out_norm[:, None]
    agg = adj @ h
    h2 = agg / in_norm[:, None]
    return h2 @ weight.T + bias[None, :]


if __name__ == "__main__":
    key = jax.random.PRNGKey(0)
    N, in_feats, out_feats = 200, 32, 16    # N not a multiple of the tile size
    tm, tk = 128, 128

    k_adj, k_feat, k_w, k_b = jax.random.split(key, 4)

    # Deterministic synthetic graph: dense 0/1 adjacency with self loops.
    adj = (jax.random.uniform(k_adj, (N, N)) < 0.1).astype(jnp.float32)
    adj = jnp.maximum(adj, jnp.eye(N, dtype=jnp.float32))

    feat = jax.random.normal(k_feat, (N, in_feats), dtype=jnp.float32)

    # Symmetric GCN norms: sqrt of in/out degrees (strictly positive).
    in_norm = jnp.sqrt(adj.sum(axis=1))   # per destination node
    out_norm = jnp.sqrt(adj.sum(axis=0))  # per source node

    # nn.Linear init: uniform(-stdv, stdv), stdv = 1/sqrt(in_feats)
    stdv = 1.0 / math.sqrt(in_feats)
    weight = jax.random.uniform(k_w, (out_feats, in_feats),
                                minval=-stdv, maxval=stdv, dtype=jnp.float32)
    bias = jax.random.uniform(k_b, (out_feats,),
                              minval=-stdv, maxval=stdv, dtype=jnp.float32)

    out = gcn_layer(adj, feat, in_norm, out_norm, weight, bias, tm=tm, tk=tk)
    out = jax.block_until_ready(out)

    ref = gcn_layer_ref(adj, feat, in_norm, out_norm, weight, bias)
    assert out.shape == (N, out_feats)
    assert jnp.allclose(out, ref, atol=1e-4, rtol=1e-4), "mismatch vs reference"

    print("KERNEL_OK")
</pallas_src>

<mosaic_0001>
module attributes {stable_mosaic.version = 11 : i64} {
  func.func @gcn_kernel(%arg0: i32, %arg1: i32, %arg2: memref<128x128xbf16, #tpu.memory_space<vmem>>, %arg3: memref<128x32xf32, #tpu.memory_space<vmem>>, %arg4: memref<128x1xf32, #tpu.memory_space<vmem>>, %arg5: memref<32x128xf32, #tpu.memory_space<vmem>>, %arg6: memref<1x128xf32, #tpu.memory_space<vmem>>, %arg7: memref<128x128xf32, #tpu.memory_space<vmem>>, %arg8: memref<128x32xf32, #tpu.memory_space<vmem>>) attributes {dimension_semantics = [#tpu.dimension_semantics<parallel>, #tpu.dimension_semantics<arbitrary>], iteration_bounds = array<i64: 2, 2>, scalar_prefetch = 0 : i64, scratch_operands = 1 : i64, tpu.core_type = #tpu.core_type<tc>, window_params = [{transform_indices = @transform_0, window_bounds = array<i64: 128, 128>}, {transform_indices = @transform_1, window_bounds = array<i64: 128, 32>}, {transform_indices = @transform_2, window_bounds = array<i64: 128, 1>}, {pipeline_mode = #tpu.pipeline_mode<synchronous>, transform_indices = @transform_3, window_bounds = array<i64: 32, 128>}, {pipeline_mode = #tpu.pipeline_mode<synchronous>, transform_indices = @transform_4, window_bounds = array<i64: 1, 128>}, {transform_indices = @transform_5, window_bounds = array<i64: 128, 128>}]} {
    %c0_i32 = arith.constant 0 : i32
    %0 = arith.cmpi eq, %arg1, %c0_i32 : i32
    %1 = arith.extui %0 : i1 to i32
    %c0_i32_0 = arith.constant 0 : i32
    %2 = arith.cmpi ne, %1, %c0_i32_0 : i32
    scf.if %2 {
      %cst_9 = arith.constant 0.000000e+00 : f32
      %13 = vector.broadcast %cst_9 : f32 to vector<128x32xf32>
      %c0_10 = arith.constant 0 : index
      %c0_11 = arith.constant 0 : index
      %14 = vector.load %arg8[%c0_10, %c0_11] : memref<128x32xf32, #tpu.memory_space<vmem>>, vector<128x32xf32>
      tpu.vector_store %arg8[%c0_10, %c0_11], %13 {strides = array<i32>} : memref<128x32xf32, #tpu.memory_space<vmem>>, vector<128x32xf32>,
    } else {
    }
    %c0 = arith.constant 0 : index
    %c0_1 = arith.constant 0 : index
    %3 = vector.load %arg8[%c0, %c0_1] : memref<128x32xf32, #tpu.memory_space<vmem>>, vector<128x32xf32>
    %c0_2 = arith.constant 0 : index
    %c0_3 = arith.constant 0 : index
    %4 = vector.load %arg2[%c0_2, %c0_3] : memref<128x128xbf16, #tpu.memory_space<vmem>>, vector<128x128xbf16>
    %5 = arith.extf %4 : vector<128x128xbf16> to vector<128x128xf32>
    %c0_4 = arith.constant 0 : index
    %c0_5 = arith.constant 0 : index
    %6 = vector.load %arg3[%c0_4, %c0_5] : memref<128x32xf32, #tpu.memory_space<vmem>>, vector<128x32xf32>
    %cst = arith.constant dense<0.000000e+00> : vector<128x32xf32>
    %7 = tpu.matmul %5, %6, %cst {dimension_numbers = #tpu.dot_dimension_numbers<[1], [0], [0], [1], [0, 0, 1, 1], [], []>} : vector<128x128xf32>, vector<128x32xf32>, vector<128x32xf32> -> vector<128x32xf32>
    %8 = arith.addf %3, %7 : vector<128x32xf32>
    %c0_6 = arith.constant 0 : index
    %c0_7 = arith.constant 0 : index
    %9 = vector.load %arg8[%c0_6, %c0_7] : memref<128x32xf32, #tpu.memory_space<vmem>>, vector<128x32xf32>
    tpu.vector_store %arg8[%c0_6, %c0_7], %8 {strides = array<i32>} : memref<128x32xf32, #tpu.memory_space<vmem>>, vector<128x32xf32>,
    %c1_i32 = arith.constant 1 : i32
    %10 = arith.cmpi eq, %arg1, %c1_i32 : i32
    %11 = arith.extui %10 : i1 to i32
    %c0_i32_8 = arith.constant 0 : i32
    %12 = arith.cmpi ne, %11, %c0_i32_8 : i32
    scf.if %12 {
      %c0_9 = arith.constant 0 : index
      %c0_10 = arith.constant 0 : index
      %13 = vector.load %arg8[%c0_9, %c0_10] : memref<128x32xf32, #tpu.memory_space<vmem>>, vector<128x32xf32>
      %c0_11 = arith.constant 0 : index
      %c0_12 = arith.constant 0 : index
      %14 = vector.load %arg4[%c0_11, %c0_12] : memref<128x1xf32, #tpu.memory_space<vmem>>, vector<128x1xf32>
      %15 = vector.broadcast %14 : vector<128x1xf32> to vector<128x32xf32>
      %16 = arith.mulf %13, %15 : vector<128x32xf32>
      %c0_13 = arith.constant 0 : index
      %c0_14 = arith.constant 0 : index
      %17 = vector.load %arg5[%c0_13, %c0_14] : memref<32x128xf32, #tpu.memory_space<vmem>>, vector<32x128xf32>
      %cst_15 = arith.constant dense<0.000000e+00> : vector<128x128xf32>
      %18 = tpu.matmul %16, %17, %cst_15 {dimension_numbers = #tpu.dot_dimension_numbers<[1], [0], [0], [1], [0, 0, 1, 1], [], []>} : vector<128x32xf32>, vector<32x128xf32>, vector<128x128xf32> -> vector<128x128xf32>
      %c0_16 = arith.constant 0 : index
      %c0_17 = arith.constant 0 : index
      %19 = vector.load %arg6[%c0_16, %c0_17] : memref<1x128xf32, #tpu.memory_space<vmem>>, vector<1x128xf32>
      %20 = vector.broadcast %19 : vector<1x128xf32> to vector<128x128xf32>
      %21 = arith.addf %18, %20 : vector<128x128xf32>
      %c0_18 = arith.constant 0 : index
      %c0_19 = arith.constant 0 : index
      %22 = vector.load %arg7[%c0_18, %c0_19] : memref<128x128xf32, #tpu.memory_space<vmem>>, vector<128x128xf32>
      tpu.vector_store %arg7[%c0_18, %c0_19], %21 {strides = array<i32>} : memref<128x128xf32, #tpu.memory_space<vmem>>, vector<128x128xf32>,
    } else {
    }
    return
  }
  func.func @transform_0(%arg0: i32, %arg1: i32) -> (i32, i32) {
    %c0_i32 = arith.constant 0 : i32
    return %arg0, %arg1 : i32, i32
  }
  func.func @transform_1(%arg0: i32, %arg1: i32) -> (i32, i32) {
    %c0_i32 = arith.constant 0 : i32
    %c0_i32_0 = arith.constant 0 : i32
    return %arg1, %c0_i32 : i32, i32
  }
  func.func @transform_2(%arg0: i32, %arg1: i32) -> (i32, i32) {
    %c0_i32 = arith.constant 0 : i32
    %c0_i32_0 = arith.constant 0 : i32
    return %arg0, %c0_i32 : i32, i32
  }
  func.func @transform_3(%arg0: i32, %arg1: i32) -> (i32, i32) {
    %c0_i32 = arith.constant 0 : i32
    %c0_i32_0 = arith.constant 0 : i32
    %c0_i32_1 = arith.constant 0 : i32
    return %c0_i32, %c0_i32_0 : i32, i32
  }
  func.func @transform_4(%arg0: i32, %arg1: i32) -> (i32, i32) {
    %c0_i32 = arith.constant 0 : i32
    %c0_i32_0 = arith.constant 0 : i32
    %c0_i32_1 = arith.constant 0 : i32
    return %c0_i32, %c0_i32_0 : i32, i32
  }
  func.func @transform_5(%arg0: i32, %arg1: i32) -> (i32, i32) {
    %c0_i32 = arith.constant 0 : i32
    %c0_i32_0 = arith.constant 0 : i32
    return %arg0, %c0_i32 : i32, i32
  }
}

</mosaic_0001>

<bundles_post_ra>
// kernel: gcn_layer.1
= control target key start
LH: loop header
LB: loop body
LE: loop exit
PB: predicated region body
PF: predicated region fallthrough
CT: control target
= control target key end

     0   :  { %s1229_s18 = smov 0   ;;  %s1231_s19 = smov 0   ;;  %s1471_s0 = inlined_call_operand.vmem [shape: bf16[256,256], index: 0, kind: input, shape index: {}]   ;;  %s1472_s1 = inlined_call_operand.vmem [shape: f32[256,32], index: 1, kind: input, shape index: {}]   ;;  %s1473_s2 = inlined_call_operand.vmem [shape: f32[256,1], index: 2, kind: input, shape index: {}]   ;;  %s1474_s3 = inlined_call_operand.vmem [shape: f32[32,128], index: 3, kind: input, shape index: {}]   ;;  %s1475_s4 = inlined_call_operand.vmem [shape: f32[1,128], index: 4, kind: input, shape index: {}]   ;;  %s1476_s5 = inlined_call_operand.vmem [shape: f32[256,128], index: 5, kind: output, shape index: {}]  }
   0x1   :  { %s1233_s20 = smov 0   ;;  %s1235_s21 = smov 0  }
   0x2   :  { %s1237_s22 = smov 0   ;;  %s1239_s23 = smov 0  }
   0x3   :  { %s1241_s24 = smov 0  }
   0x4 LB: > { %s24_s25 = sadd.s32 1, %s1187_s22  ;;  %s27_s26 = sadd.s32 1, %s1191_s23  ;;  %s1195_s24 = sphi %s1241_s24, %s15_s24   ;;  %s1191_s23 = sphi %s1239_s23, %s1482_s23   ;;  %s1187_s22 = sphi %s1237_s22, %s1481_s22   ;;  %s1183_s21 = sphi %s1235_s21, %s1480_s21   ;;  %s1179_s20 = sphi %s1233_s20, %s1479_s20   ;;  %s1175_s19 = sphi %s1231_s19, %s1478_s19   ;;  %s1171_s18 = sphi %s1229_s18, %s1477_s18  }
   0x5   : > { %p25_p0 = scmp.ge.s32.totalorder %s24_s25, 2  ;;  %p43_p1 = scmp.ne.s32.totalorder %s1175_s19, %s1171_s18 }
   0x6   : > { %p44_p2 = scmp.eq.s32.totalorder %s1195_s24, 0  ;;  %s36_s30 = sadd.s32 1, %s1175_s19 }
   0x7   : > { %s1484_s25 = smov (%p25_p0, %s24_s25), 0  ;;  %s1486_s26 = smov (!%p25_p0, %s27_s26), %s1191_s23 }
   0x8   : > { %p45_p3 = por %p44_p2, %p43_p1  ;;  %p29_p4 = scmp.ge.s32.totalorder %s1486_s26, 2 }
   0x9   : > { %s32_s27 = ssub.s32 %s1187_s22, %s1484_s25  ;;  %p946_p6 = scmp.ge.s32.totalorder %s1195_s24, 4 }
   0xa   : > { %s1488_s26 = smov (%p29_p4, %s1486_s26), 0 }
   0xb   : > { %s31_s28 = ssub.s32 %s1191_s23, %s1488_s26  ;;  %195 = sbr.rel (%p946_p6) target bundleno = 38 (0x26), region = 24 }
   0xc   : > { %s33_s29 = sor.u32 %s32_s27, %s31_s28 }
   0xd   : > { %p34_p5 = scmp.eq.s32.totalorder %s33_s29, 0 }
   0xf   : > { %s1280_s6 = scalar_select %p34_p5, %s1175_s19, %s36_s30  }
  0x10   : > { %198 = sbr.rel (!%p45_p3) target bundleno = 38 (0x26), region = 28  ;;  %s200_s7 = sand.u32 (%p45_p3), 1, %s1175_s19  }
  0x11   : > { %s979_s8 = sshll.u32 (%p45_p3), %s1191_s23, 5  ;;  %s947_s9 = sshll.u32 (%p45_p3), %s200_s7, 6 }
  0x12   : > { %s205_s10 = sadd.s32 (%p45_p3), %s1187_s22, %s979_s8  ;;  %s202_s15 = scalar_lea.vmem (%p45_p3), [#allocation3], %s947_s9 }
  0x13   : > { %s950_s11 = sshll.u32 (%p45_p3), %s205_s10, 2 }
  0x14   : > { %s1289_s14 = scalar_lea.vmem (%p45_p3), %s1471_s0, %s950_s11 }
  0x15   : > { %v224_v0 = vld [vmem:[%s1289_s14] sm:$0xf]  ;;  %v226_v1 = vld [vmem:[%s1289_s14 + $0x8] sm:$0xf]  ;;  %v228_v2 = vld [vmem:[%s1289_s14 + $0x10] sm:$0xf] }
  0x16   : > { %225 = vst [vmem:[%s202_s15] sm:$0xf] %v224_v0  ;;  %v230_v3 = vld [vmem:[%s1289_s14 + $0x18] sm:$0xf]  ;;  %v232_v4 = vld [vmem:[%s1289_s14 + $0x20] sm:$0xf] }
  0x17   : > { %227 = vst [vmem:[%s202_s15 + $0x4] sm:$0xf] %v226_v1  ;;  %v234_v5 = vld [vmem:[%s1289_s14 + $0x28] sm:$0xf]  ;;  %v236_v6 = vld [vmem:[%s1289_s14 + $0x30] sm:$0xf] }
  0x18   : > { %229 = vst [vmem:[%s202_s15 + $0x8] sm:$0xf] %v228_v2  ;;  %v238_v7 = vld [vmem:[%s1289_s14 + $0x38] sm:$0xf]  ;;  %v240_v8 = vld [vmem:[%s1289_s14 + $0x40] sm:$0xf] }
  0x19   : > { %231 = vst [vmem:[%s202_s15 + $0xc] sm:$0xf] %v230_v3  ;;  %v242_v9 = vld [vmem:[%s1289_s14 + $0x48] sm:$0xf]  ;;  %v244_v10 = vld [vmem:[%s1289_s14 + $0x50] sm:$0xf] }
  0x1a   : > { %233 = vst [vmem:[%s202_s15 + $0x10] sm:$0xf] %v232_v4  ;;  %v246_v11 = vld [vmem:[%s1289_s14 + $0x58] sm:$0xf]  ;;  %v248_v12 = vld [vmem:[%s1289_s14 + $0x60] sm:$0xf] }
  0x1b   : > { %235 = vst [vmem:[%s202_s15 + $0x14] sm:$0xf] %v234_v5  ;;  %v250_v13 = vld [vmem:[%s1289_s14 + $0x68] sm:$0xf]  ;;  %v252_v14 = vld [vmem:[%s1289_s14 + $0x70] sm:$0xf] }
  0x1c   : > { %237 = vst [vmem:[%s202_s15 + $0x18] sm:$0xf] %v236_v6  ;;  %v254_v15 = vld [vmem:[%s1289_s14 + $0x78] sm:$0xf] }
  0x1d   : > { %239 = vst [vmem:[%s202_s15 + $0x1c] sm:$0xf] %v238_v7 }
  0x1e   : > { %241 = vst [vmem:[%s202_s15 + $0x20] sm:$0xf] %v240_v8 }
  0x1f   : > { %243 = vst [vmem:[%s202_s15 + $0x24] sm:$0xf] %v242_v9 }
  0x20   : > { %245 = vst [vmem:[%s202_s15 + $0x28] sm:$0xf] %v244_v10 }
  0x21   : > { %247 = vst [vmem:[%s202_s15 + $0x2c] sm:$0xf] %v246_v11 }
  0x22   : > { %249 = vst [vmem:[%s202_s15 + $0x30] sm:$0xf] %v248_v12 }
  0x23   : > { %251 = vst [vmem:[%s202_s15 + $0x34] sm:$0xf] %v250_v13 }
  0x24   : > { %253 = vst [vmem:[%s202_s15 + $0x38] sm:$0xf] %v252_v14 }
  0x25   : > { %255 = vst [vmem:[%s202_s15 + $0x3c] sm:$0xf] %v254_v15 }
  0x26 PF: > { %p951_p7 = scmp.ge.s32.totalorder %s1195_s24, 1  ;;  %p328_p8 = scmp.lt.s32.totalorder %s1195_s24, 5 }
  0x28   : > { %p329_p9 = pnand %p951_p7, %p328_p8 }
  0x29   : > { %s335_s16 = sand.u32 (!%p329_p9), 1, %s1171_s18   ;;  %s953_s17 = sshll.u32 (!%p329_p9), %s1179_s20, 4 }
  0x2a   : > { %332 = sbr.rel (%p329_p9) target bundleno = 553 (0x229), region = 77  ;;  %s952_s27 = sshll.u32 (!%p329_p9), %s335_s16, 6 }
  0x2b   : > { %p374_p10 = scmp.lt.s32.totalorder (!%p329_p9), %s953_s17, 31  ;;  %s955_s28 = sshll.u32 (!%p329_p9), %s1183_s21, 4 }
  0x2c   : > { %p380_p11 = scmp.lt.s32.totalorder (!%p329_p9), %s955_s28, 31  ;;  %s1327_s21 = scalar_lea.vmem (!%p329_p9), [#allocation3], %s952_s27 }
  0x2d   : > { %p959_p12 = scmp.ne.s32.totalorder (!%p329_p9), %s1179_s20, 0 }
  0x2f   : > { %s1490_s17 = smov (!%p374_p10, %s953_s17), 31  ;;  %s1492_s28 = smov (!%p380_p11, %s955_s28), 31 }
  0x30   : > { %s954_s29 = sshll.u32 %s1490_s17, 3  ;;  %s956_s9 = sshll.u32 %s1492_s28, 3 }
  0x31   : > { %s1315_s8 = scalar_lea.vmem %s1472_s1, %s954_s29  ;;  %s1320_s12 = scalar_lea.vmem %s1473_s2, %s956_s9 }
  0x32   : > { %s1325_s14 = scalar_lea.vmem %s1476_s5, %s956_s9  ;;  %394 = sbr.rel (%p959_p12) target bundleno = 72 (0x48), region = 85 }
  0x37   : > { %vm395_vm0 = vcmask 261120   ;;  %v1197_v16 = vmov 0.0  }
  0x38   : > { %396 = vst.msk [vmem:[#allocation2] sm:$0xff] %vm395_vm0, %v1197_v16 }
  0x39   : > { %397 = vst.msk [vmem:[#allocation2 + $0x8] sm:$0xff] %vm395_vm0, %v1197_v16 }
  0x3a   : > { %398 = vst.msk [vmem:[#allocation2 + $0x10] sm:$0xff] %vm395_vm0, %v1197_v16 }
  0x3b   : > { %399 = vst.msk [vmem:[#allocation2 + $0x18] sm:$0xff] %vm395_vm0, %v1197_v16 }
  0x3c   : > { %400 = vst.msk [vmem:[#allocation2 + $0x20] sm:$0xff] %vm395_vm0, %v1197_v16 }
  0x3d   : > { %401 = vst.msk [vmem:[#allocation2 + $0x28] sm:$0xff] %vm395_vm0, %v1197_v16 }
  0x3e   : > { %402 = vst.msk [vmem:[#allocation2 + $0x30] sm:$0xff] %vm395_vm0, %v1197_v16 }
  0x3f   : > { %403 = vst.msk [vmem:[#allocation2 + $0x38] sm:$0xff] %vm395_vm0, %v1197_v16 }
  0x40   : > { %404 = vst.msk [vmem:[#allocation2 + $0x40] sm:$0xff] %vm395_vm0, %v1197_v16 }
  0x41   : > { %405 = vst.msk [vmem:[#allocation2 + $0x48] sm:$0xff] %vm395_vm0, %v1197_v16 }
  0x42   : > { %406 = vst.msk [vmem:[#allocation2 + $0x50] sm:$0xff] %vm395_vm0, %v1197_v16 }
  0x43   : > { %407 = vst.msk [vmem:[#allocation2 + $0x58] sm:$0xff] %vm395_vm0, %v1197_v16 }
  0x44   : > { %408 = vst.msk [vmem:[#allocation2 + $0x60] sm:$0xff] %vm395_vm0, %v1197_v16 }
  0x45   : > { %409 = vst.msk [vmem:[#allocation2 + $0x68] sm:$0xff] %vm395_vm0, %v1197_v16 }
  0x46   : > { %410 = vst.msk [vmem:[#allocation2 + $0x70] sm:$0xff] %vm395_vm0, %v1197_v16 }
  0x47   : > { %411 = vst.msk [vmem:[#allocation2 + $0x78] sm:$0xff] %vm395_vm0, %v1197_v16 }
  0x48 PF: > { %v475_v17 = vld [vmem:[%s1315_s8 + $0x78] sm:$0xff]  ;;  %v474_v18 = vld [vmem:[%s1315_s8 + $0x70] sm:$0xff]  ;;  %v473_v19 = vld [vmem:[%s1315_s8 + $0x68] sm:$0xff]  ;;  %vm557_vm1 = vcmask 261120   ;;  %p960_p13 = scmp.ne.s32.totalorder %s1179_s20, 1 }
  0x49   : > { %1020 = vmatpush.msra.mxu2 %v475_v17  ;;  %1021 = vmatpush.msra.mxu3 %v475_v17  ;;  %v472_v20 = vld [vmem:[%s1315_s8 + $0x60] sm:$0xff]  ;;  %v471_v21 = vld [vmem:[%s1315_s8 + $0x58] sm:$0xff]  ;;  %v470_v22 = vld [vmem:[%s1315_s8 + $0x50] sm:$0xff] }
  0x4a   : > { %476 = vmatpush.msra.mxu0 %v475_v17  ;;  %1019 = vmatpush.msra.mxu1 %v475_v17  ;;  %v469_v23 = vld [vmem:[%s1315_s8 + $0x48] sm:$0xff]  ;;  %v468_v24 = vld [vmem:[%s1315_s8 + $0x40] sm:$0xff]  ;;  %v467_v25 = vld [vmem:[%s1315_s8 + $0x38] sm:$0xff] }
  0x4b   : > { %1023 = vmatpush.msra.mxu2 %v474_v18  ;;  %1024 = vmatpush.msra.mxu3 %v474_v18  ;;  %v466_v26 = vld [vmem:[%s1315_s8 + $0x30] sm:$0xff]  ;;  %v465_v27 = vld [vmem:[%s1315_s8 + $0x28] sm:$0xff]  ;;  %v464_v28 = vld [vmem:[%s1315_s8 + $0x20] sm:$0xff] }
  0x4c   : > { %477 = vmatpush.msra.mxu0 %v474_v18  ;;  %1022 = vmatpush.msra.mxu1 %v474_v18  ;;  %v463_v29 = vld [vmem:[%s1315_s8 + $0x18] sm:$0xff]  ;;  %v462_v30 = vld [vmem:[%s1315_s8 + $0x10] sm:$0xff]  ;;  %v1015_v31 = vld [vmem:[%s1327_s21 + $0x20] sm:$0xff]  }
  0x4d   : > { %1026 = vmatpush.msra.mxu2 %v473_v19  ;;  %1027 = vmatpush.msra.mxu3 %v473_v19  ;;  %v1017_v32 = vld [vmem:[%s1327_s21 + $0x30] sm:$0xff]   ;;  %v461_v33 = vld [vmem:[%s1315_s8 + $0x8] sm:$0xff]  ;;  %v981_v34 = vld [vmem:[%s1327_s21] sm:$0xff]   ;;  %v998_v37 = vunpack.c.l.bf16 %v1015_v31  ;;  %v999_v41 = vunpack.c.h.bf16 %v1015_v31 }
  0x4e   : > { %478 = vmatpush.msra.mxu0 %v473_v19  ;;  %1025 = vmatpush.msra.mxu1 %v473_v19  ;;  %v1013_v35 = vld [vmem:[%s1327_s21 + $0x10] sm:$0xff]   ;;  %v460_v36 = vld [vmem:[%s1315_s8] sm:$0xff]  ;;  %v1006_v38 = vunpack.c.l.bf16 %v1017_v32  ;;  %v982_v39 = vunpack.c.l.bf16 %v981_v34  ;;  %v1007_v42 = vunpack.c.h.bf16 %v1017_v32  ;;  %v983_v43 = vunpack.c.h.bf16 %v981_v34  ;;  %v1016_v45 = vld [vmem:[%s1327_s21 + $0x28] sm:$0xff]  }
  0x4f   : > { %1029 = vmatpush.msra.mxu2 %v472_v20  ;;  %1030 = vmatpush.msra.mxu3 %v472_v20  ;;  %v990_v40 = vunpack.c.l.bf16 %v1013_v35  ;;  %v991_v44 = vunpack.c.h.bf16 %v1013_v35  ;;  %v1018_v46 = vld [vmem:[%s1327_s21 + $0x38] sm:$0xff]   ;;  %v1012_v47 = vld [vmem:[%s1327_s21 + $0x8] sm:$0xff]   ;;  %v1002_v49 = vunpack.c.l.bf16 %v1016_v45  ;;  %v1003_v53 = vunpack.c.h.bf16 %v1016_v45  ;;  %v412_v57 = vld [vmem:[#allocation2] sm:$0xff] }
  0x50   : > { %479 = vmatpush.msra.mxu0 %v472_v20  ;;  %1028 = vmatpush.msra.mxu1 %v472_v20  ;;  %v1014_v48 = vld [vmem:[%s1327_s21 + $0x18] sm:$0xff]   ;;  %v1010_v50 = vunpack.c.l.bf16 %v1018_v46  ;;  %v986_v51 = vunpack.c.l.bf16 %v1012_v47  ;;  %v1011_v54 = vunpack.c.h.bf16 %v1018_v46  ;;  %v987_v55 = vunpack.c.h.bf16 %v1012_v47  ;;  %v416_v58 = vld [vmem:[#allocation2 + $0x20] sm:$0xff]  ;;  %v413_v5 = vld [vmem:[#allocation2 + $0x8] sm:$0xff] }
  0x51   : > { %1032 = vmatpush.msra.mxu2 %v471_v21  ;;  %1033 = vmatpush.msra.mxu3 %v471_v21  ;;  %v994_v52 = vunpack.c.l.bf16 %v1014_v48  ;;  %v995_v56 = vunpack.c.h.bf16 %v1014_v48  ;;  %v420_v63 = vld [vmem:[#allocation2 + $0x40] sm:$0xff]  ;;  %v417_v6 = vld [vmem:[#allocation2 + $0x28] sm:$0xff]  ;;  %v414_v17 = vld [vmem:[#allocation2 + $0x10] sm:$0xff] }
  0x52   : > { %480 = vmatpush.msra.mxu0 %v471_v21  ;;  %1031 = vmatpush.msra.mxu1 %v471_v21  ;;  %v424_v0 = vld [vmem:[#allocation2 + $0x60] sm:$0xff]  ;;  %v421_v11 = vld [vmem:[#allocation2 + $0x48] sm:$0xff]  ;;  %v418_v18 = vld [vmem:[#allocation2 + $0x30] sm:$0xff] }
  0x53   : > { %1035 = vmatpush.msra.mxu2 %v470_v22  ;;  %1036 = vmatpush.msra.mxu3 %v470_v22  ;;  %v425_v12 = vld [vmem:[#allocation2 + $0x68] sm:$0xff]  ;;  %v423_v35 = vld [vmem:[#allocation2 + $0x58] sm:$0xff] }
  0x54   : > { %481 = vmatpush.msra.mxu0 %v470_v22  ;;  %1034 = vmatpush.msra.mxu1 %v470_v22 }
  0x55   : > { %1038 = vmatpush.msra.mxu2 %v469_v23  ;;  %1039 = vmatpush.msra.mxu3 %v469_v23 }
  0x56   : > { %482 = vmatpush.msra.mxu0 %v469_v23  ;;  %1037 = vmatpush.msra.mxu1 %v469_v23  ;;  %v422_v23 = vld [vmem:[#allocation2 + $0x50] sm:$0xff] }
  0x57   : > { %1041 = vmatpush.msra.mxu2 %v468_v24  ;;  %1042 = vmatpush.msra.mxu3 %v468_v24 }
  0x58   : > { %483 = vmatpush.msra.mxu0 %v468_v24  ;;  %1040 = vmatpush.msra.mxu1 %v468_v24  ;;  %v426_v24 = vld [vmem:[#allocation2 + $0x70] sm:$0xff] }
  0x59   : > { %1044 = vmatpush.msra.mxu2 %v467_v25  ;;  %1045 = vmatpush.msra.mxu3 %v467_v25 }
  0x5a   : > { %484 = vmatpush.msra.mxu0 %v467_v25  ;;  %1043 = vmatpush.msra.mxu1 %v467_v25 }
  0x5b   : > { %1047 = vmatpush.msra.mxu2 %v466_v26  ;;  %1048 = vmatpush.msra.mxu3 %v466_v26 }
  0x5c   : > { %485 = vmatpush.msra.mxu0 %v466_v26  ;;  %1046 = vmatpush.msra.mxu1 %v466_v26 }
  0x5d   : > { %1050 = vmatpush.msra.mxu2 %v465_v27  ;;  %1051 = vmatpush.msra.mxu3 %v465_v27 }
  0x5e   : > { %486 = vmatpush.msra.mxu0 %v465_v27  ;;  %1049 = vmatpush.msra.mxu1 %v465_v27 }
  0x5f   : > { %1053 = vmatpush.msra.mxu2 %v464_v28  ;;  %1054 = vmatpush.msra.mxu3 %v464_v28 }
  0x60   : > { %487 = vmatpush.msra.mxu0 %v464_v28  ;;  %1052 = vmatpush.msra.mxu1 %v464_v28 }
  0x61   : > { %1056 = vmatpush.msra.mxu2 %v463_v29  ;;  %1057 = vmatpush.msra.mxu3 %v463_v29 }
  0x62   : > { %488 = vmatpush.msra.mxu0 %v463_v29  ;;  %1055 = vmatpush.msra.mxu1 %v463_v29  ;;  %v415_v29 = vld [vmem:[#allocation2 + $0x18] sm:$0xff] }
  0x63   : > { %1059 = vmatpush.msra.mxu2 %v462_v30  ;;  %1060 = vmatpush.msra.mxu3 %v462_v30 }
  0x64   : > { %489 = vmatpush.msra.mxu0 %v462_v30  ;;  %1058 = vmatpush.msra.mxu1 %v462_v30  ;;  %v419_v30 = vld [vmem:[#allocation2 + $0x38] sm:$0xff] }
  0x65   : > { %1062 = vmatpush.msra.mxu2 %v461_v33  ;;  %1063 = vmatpush.msra.mxu3 %v461_v33 }
  0x66   : > { %490 = vmatpush.msra.mxu0 %v461_v33  ;;  %1061 = vmatpush.msra.mxu1 %v461_v33 }
  0x67   : > { %1065 = vmatpush.msra.mxu2 %v460_v36  ;;  %1066 = vmatpush.msra.mxu3 %v460_v36 }
  0x68   : > { %516 = vmatmul.f32.vlgmr.msra.gmra.mxu2 %v998_v37  ;;  %528 = vmatmul.f32.vlgmr.msra.gmra.mxu3 %v1006_v38 }
  0x69   : > { %491 = vmatpush.msra.mxu0 %v460_v36  ;;  %1064 = vmatpush.msra.mxu1 %v460_v36  ;;  %v427_v36 = vld [vmem:[#allocation2 + $0x78] sm:$0xff] }
  0x6a   : > { %492 = vmatmul.f32.vlgmr.msra.gmra.mxu0 %v982_v39  ;;  %504 = vmatmul.f32.vlgmr.msra.gmra.mxu1 %v990_v40 }
  0x70   : > { %519 = vmatmul.f32.gmra.mxu2 %v999_v41  ;;  %531 = vmatmul.f32.gmra.mxu3 %v1007_v42 }
  0x72   : > { %495 = vmatmul.f32.gmra.mxu0 %v983_v43  ;;  %507 = vmatmul.f32.gmra.mxu1 %v991_v44 }
  0x78   : > { %522 = vmatmul.f32.gmra.mxu2 %v1002_v49  ;;  %534 = vmatmul.f32.gmra.mxu3 %v1010_v50 }
  0x7a   : > { %498 = vmatmul.f32.gmra.mxu0 %v986_v51  ;;  %510 = vmatmul.f32.gmra.mxu1 %v994_v52 }
  0x80   : > { %525 = vmatmul.f32.gmra.mxu2 %v1003_v53  ;;  %537 = vmatmul.f32.gmra.mxu3 %v1011_v54 }
  0x82   : > { %501 = vmatmul.f32.gmra.mxu0 %v987_v55  ;;  %513 = vmatmul.f32.gmra.mxu1 %v995_v56 }
  0xe7   : > { %v493_v59 = vpop.f32.mrf.mxu0  ;;  %v505_v60 = vpop.f32.mrf.mxu1 }
  0xe8   : > { %v541_v61 = vadd.f32 %v493_v59, %v412_v57  ;;  %v545_v62 = vadd.f32 %v505_v60, %v416_v58 }
  0xea   : > { %558 = vst.msk [vmem:[#allocation2] sm:$0xff] %vm557_vm1, %v541_v61 }
  0xeb   : > { %562 = vst.msk [vmem:[#allocation2 + $0x20] sm:$0xff] %vm557_vm1, %v545_v62  ;;  %v517_v1 = vpop.f32.mrf.mxu2  ;;  %v529_v2 = vpop.f32.mrf.mxu3 }
  0xec   : > { %v549_v3 = vadd.f32 %v517_v1, %v420_v63  ;;  %v553_v4 = vadd.f32 %v529_v2, %v424_v0 }
  0xee   : > { %566 = vst.msk [vmem:[#allocation2 + $0x40] sm:$0xff] %vm557_vm1, %v549_v3 }
  0xef   : > { %570 = vst.msk [vmem:[#allocation2 + $0x60] sm:$0xff] %vm557_vm1, %v553_v4  ;;  %v496_v7 = vpop.f32.mrf.mxu0  ;;  %v508_v8 = vpop.f32.mrf.mxu1 }
  0xf0   : > { %v542_v9 = vadd.f32 %v496_v7, %v413_v5  ;;  %v546_v10 = vadd.f32 %v508_v8, %v417_v6 }
  0xf2   : > { %559 = vst.msk [vmem:[#allocation2 + $0x8] sm:$0xff] %vm557_vm1, %v542_v9 }
  0xf3   : > { %563 = vst.msk [vmem:[#allocation2 + $0x28] sm:$0xff] %vm557_vm1, %v546_v10  ;;  %v520_v13 = vpop.f32.mrf.mxu2  ;;  %v532_v14 = vpop.f32.mrf.mxu3 }
  0xf4   : > { %v550_v15 = vadd.f32 %v520_v13, %v421_v11  ;;  %v554_v16 = vadd.f32 %v532_v14, %v425_v12 }
  0xf6   : > { %567 = vst.msk [vmem:[#allocation2 + $0x48] sm:$0xff] %vm557_vm1, %v550_v15 }
  0xf7   : > { %571 = vst.msk [vmem:[#allocation2 + $0x68] sm:$0xff] %vm557_vm1, %v554_v16  ;;  %v499_v19 = vpop.f32.mrf.mxu0  ;;  %v511_v20 = vpop.f32.mrf.mxu1 }
  0xf8   : > { %v543_v21 = vadd.f32 %v499_v19, %v414_v17  ;;  %v547_v22 = vadd.f32 %v511_v20, %v418_v18 }
  0xfa   : > { %560 = vst.msk [vmem:[#allocation2 + $0x10] sm:$0xff] %vm557_vm1, %v543_v21 }
  0xfb   : > { %564 = vst.msk [vmem:[#allocation2 + $0x30] sm:$0xff] %vm557_vm1, %v547_v22  ;;  %v523_v25 = vpop.f32.mrf.mxu2  ;;  %v535_v26 = vpop.f32.mrf.mxu3 }
  0xfc   : > { %v551_v27 = vadd.f32 %v523_v25, %v422_v23  ;;  %v555_v28 = vadd.f32 %v535_v26, %v426_v24 }
  0xfe   : > { %568 = vst.msk [vmem:[#allocation2 + $0x50] sm:$0xff] %vm557_vm1, %v551_v27 }
  0xff   : > { %572 = vst.msk [vmem:[#allocation2 + $0x70] sm:$0xff] %vm557_vm1, %v555_v28  ;;  %v502_v31 = vpop.f32.mrf.mxu0  ;;  %v514_v32 = vpop.f32.mrf.mxu1 }
 0x100   : > { %v544_v33 = vadd.f32 %v502_v31, %v415_v29  ;;  %v548_v34 = vadd.f32 %v514_v32, %v419_v30 }
 0x102   : > { %561 = vst.msk [vmem:[#allocation2 + $0x18] sm:$0xff] %vm557_vm1, %v544_v33 }
 0x103   : > { %565 = vst.msk [vmem:[#allocation2 + $0x38] sm:$0xff] %vm557_vm1, %v548_v34  ;;  %v526_v37 = vpop.f32.mrf.mxu2  ;;  %v538_v38 = vpop.f32.mrf.mxu3  ;;  %577 = sbr.rel (%p960_p13) target bundleno = 553 (0x229), region = 89 }
 0x104   : > { %v552_v39 = vadd.f32 %v526_v37, %v423_v35  ;;  %v556_v40 = vadd.f32 %v538_v38, %v427_v36 }
 0x106   : > { %569 = vst.msk [vmem:[#allocation2 + $0x58] sm:$0xff] %vm557_vm1, %v552_v39 }
 0x107   : > { %573 = vst.msk [vmem:[#allocation2 + $0x78] sm:$0xff] %vm557_vm1, %v556_v40 }
 0x108   : > { %v603_v41 = vld [vmem:[%s1320_s12 + $0x48] sm:$0xff]  ;;  %v602_v42 = vld [vmem:[%s1320_s12 + $0x40] sm:$0xff]  ;;  %v1198_v44 = vmov 0   ;;  %v604_v48 = vld [vmem:[%s1320_s12 + $0x50] sm:$0xff] }
 0x109   : > { %v594_v43 = vld [vmem:[%s1320_s12] sm:$0xff]  ;;  %1139 = vset.pattern.permute.xlu2 %v1198_v44  ;;  %1138 = vset.pattern.permute.xlu1 %v1198_v44  ;;  %v607_v45 = vld [vmem:[%s1320_s12 + $0x68] sm:$0xff]  ;;  %v600_v51 = vld [vmem:[%s1320_s12 + $0x30] sm:$0xff] }
 0x10a   : > { %1137 = vset.pattern.permute.xlu0 %v1198_v44  ;;  %657 = vperm.xlu2 %1139, %v603_v41   ;;  %v606_v46 = vld [vmem:[%s1320_s12 + $0x60] sm:$0xff]  ;;  %v595_v49 = vld [vmem:[%s1320_s12 + $0x8] sm:$0xff]  ;;  %v608_v52 = vld [vmem:[%s1320_s12 + $0x70] sm:$0xff] }
 0x10b   : > { %652 = vperm.xlu0 %1137, %v602_v42   ;;  %612 = vperm.xlu1 %1138, %v594_v43   ;;  %v598_v47 = vld [vmem:[%s1320_s12 + $0x20] sm:$0xff]  ;;  %v599_v50 = vld [vmem:[%s1320_s12 + $0x28] sm:$0xff]  ;;  %v596_v53 = vld [vmem:[%s1320_s12 + $0x10] sm:$0xff] }
 0x10c   : > { %v597_v54 = vld [vmem:[%s1320_s12 + $0x18] sm:$0xff]  ;;  %v708_v59 = vld [vmem:[%s1474_s3 + $0x10] sm:$0xff]  ;;  %v707_v60 = vld [vmem:[%s1474_s3 + $0x8] sm:$0xff] }
 0x10d   : > { %v605_v55 = vld [vmem:[%s1320_s12 + $0x58] sm:$0xff]  ;;  %v706_v61 = vld [vmem:[%s1474_s3] sm:$0xff]  ;;  %v587_v6 = vld [vmem:[#allocation2 + $0x48] sm:$0xff] }
 0x10e   : > { %v609_v56 = vld [vmem:[%s1320_s12 + $0x78] sm:$0xff]  ;;  %v586_v63 = vld [vmem:[#allocation2 + $0x40] sm:$0xff]  ;;  %v579_v15 = vld [vmem:[#allocation2 + $0x8] sm:$0xff] }
 0x10f   : > { %v601_v57 = vld [vmem:[%s1320_s12 + $0x38] sm:$0xff]  ;;  %v578_v0 = vld [vmem:[#allocation2] sm:$0xff]  ;;  %v583_v16 = vld [vmem:[#allocation2 + $0x28] sm:$0xff] }
 0x110   : > { %v709_v58 = vld [vmem:[%s1474_s3 + $0x18] sm:$0xff]  ;;  %v590_v7 = vld [vmem:[#allocation2 + $0x60] sm:$0xff]  ;;  %v591_v17 = vld [vmem:[#allocation2 + $0x68] sm:$0xff] }
 0x111   : > { %1068 = vmatpush.msra.mxu2 %v709_v58  ;;  %774 = vmatpush.msra.mxu0 %v709_v58  ;;  %v582_v8 = vld [vmem:[#allocation2 + $0x20] sm:$0xff]  ;;  %v588_v18 = vld [vmem:[#allocation2 + $0x50] sm:$0xff]  ;;  %v581_v35 = vld [vmem:[#allocation2 + $0x18] sm:$0xff] }
 0x112   : > { %677 = vperm.xlu2 %1139, %v607_v45   ;;  %1067 = vmatpush.msra.mxu1 %v709_v58  ;;  %v584_v26 = vld [vmem:[#allocation2 + $0x30] sm:$0xff]  ;;  %v589_v36 = vld [vmem:[#allocation2 + $0x58] sm:$0xff] }
 0x113   : > { %672 = vperm.xlu0 %1137, %v606_v46   ;;  %632 = vperm.xlu1 %1138, %v598_v47   ;;  %v592_v27 = vld [vmem:[#allocation2 + $0x70] sm:$0xff]  ;;  %v593_v37 = vld [vmem:[#allocation2 + $0x78] sm:$0xff]  ;;  %v1140_v46 = vld [vmem:[%s1475_s4] ss:$0 sm:$0xff] }
 0x114   : > { %1069 = vmatpush.msra.mxu3 %v709_v58  ;;  %1071 = vmatpush.msra.mxu2 %v708_v59  ;;  %v580_v28 = vld [vmem:[#allocation2 + $0x10] sm:$0xff]  ;;  %v585_v43 = vld [vmem:[#allocation2 + $0x38] sm:$0xff] }
 0x115   : > { %775 = vmatpush.msra.mxu0 %v708_v59  ;;  %1070 = vmatpush.msra.mxu1 %v708_v59 }
 0x116   : > { %1072 = vmatpush.msra.mxu3 %v708_v59  ;;  %1074 = vmatpush.msra.mxu2 %v707_v60 }
 0x117   : > { %776 = vmatpush.msra.mxu0 %v707_v60  ;;  %1073 = vmatpush.msra.mxu1 %v707_v60 }
 0x118   : > { %1075 = vmatpush.msra.mxu3 %v707_v60  ;;  %1077 = vmatpush.msra.mxu2 %v706_v61 }
 0x119   : > { %777 = vmatpush.msra.mxu0 %v706_v61  ;;  %1076 = vmatpush.msra.mxu1 %v706_v61 }
 0x11a   : > { %662 = vperm.xlu2 %1139, %v604_v48   ;;  %1078 = vmatpush.msra.mxu3 %v706_v61 }
 0x11b   : > { %617 = vperm.xlu0 %1137, %v595_v49   ;;  %637 = vperm.xlu1 %1138, %v599_v50  }
 0x122   : > { %642 = vperm.xlu2 %1139, %v600_v51  }
 0x123   : > { %682 = vperm.xlu0 %1137, %v608_v52   ;;  %622 = vperm.xlu1 %1138, %v596_v53  }
 0x12a   : > { %627 = vperm.xlu2 %1139, %v597_v54  }
 0x12b   : > { %667 = vperm.xlu0 %1137, %v605_v55   ;;  %687 = vperm.xlu1 %1138, %v609_v56  }
 0x133   : > { %647 = vperm.xlu0 %1137, %v601_v57  }
 0x164   : > { %v658_v62 = vpop.permute.xlu2 %657 }
 0x165   : > { %v699_v9 = vmul.f32 %v658_v62, %v587_v6 }
 0x16c   : > { %v678_v1 = vpop.permute.xlu2 %677 }
 0x16d   : > { %v703_v23 = vmul.f32 %v678_v1, %v591_v17 }
 0x174   : > { %v663_v14 = vpop.permute.xlu2 %662 }
 0x175   : > { %v700_v24 = vmul.f32 %v663_v14, %v588_v18 }
 0x17c   : > { %v643_v25 = vpop.permute.xlu2 %642 }
 0x17d   : > { %v653_v2 = vpop.permute.xlu0 %652  ;;  %v613_v3 = vpop.permute.xlu1 %612  ;;  %v696_v31 = vmul.f32 %v643_v25, %v584_v26 }
 0x17e   : > { %v698_v4 = vmul.f32 %v653_v2, %v586_v63  ;;  %v690_v5 = vmul.f32 %v613_v3, %v578_v0 }
 0x180   : > { %969 = vmatmul.msk.f32.vlgmr.msra.gmra.mxu2 %vm557_vm1, %v698_v4  ;;  %961 = vmatmul.msk.f32.vlgmr.msra.gmra.mxu0 %vm557_vm1, %v690_v5 }
 0x184   : > { %v628_v34 = vpop.permute.xlu2 %627 }
 0x185   : > { %v673_v10 = vpop.permute.xlu0 %672  ;;  %v633_v11 = vpop.permute.xlu1 %632  ;;  %v693_v40 = vmul.f32 %v628_v34, %v581_v35 }
 0x186   : > { %v702_v12 = vmul.f32 %v673_v10, %v590_v7  ;;  %v694_v13 = vmul.f32 %v633_v11, %v582_v8 }
 0x188   : > { %965 = vmatmul.msk.f32.vlgmr.msra.gmra.mxu1 %vm557_vm1, %v694_v13  ;;  %970 = vmatmul.msk.f32.gmra.mxu2 %vm557_vm1, %v699_v9 }
 0x189   : > { %973 = vmatmul.msk.f32.vlgmr.msra.gmra.mxu3 %vm557_vm1, %v702_v12 }
 0x18d   : > { %v618_v19 = vpop.permute.xlu0 %617  ;;  %v638_v20 = vpop.permute.xlu1 %637 }
 0x18e   : > { %v691_v21 = vmul.f32 %v618_v19, %v579_v15  ;;  %v695_v22 = vmul.f32 %v638_v20, %v583_v16 }
 0x190   : > { %962 = vmatmul.msk.f32.gmra.mxu0 %vm557_vm1, %v691_v21  ;;  %966 = vmatmul.msk.f32.gmra.mxu1 %vm557_vm1, %v695_v22 }
 0x191   : > { %971 = vmatmul.msk.f32.gmra.mxu2 %vm557_vm1, %v700_v24  ;;  %974 = vmatmul.msk.f32.gmra.mxu3 %vm557_vm1, %v703_v23 }
 0x195   : > { %v683_v29 = vpop.permute.xlu0 %682  ;;  %v623_v30 = vpop.permute.xlu1 %622 }
 0x196   : > { %v704_v32 = vmul.f32 %v683_v29, %v592_v27  ;;  %v692_v33 = vmul.f32 %v623_v30, %v580_v28 }
 0x198   : > { %963 = vmatmul.msk.f32.gmra.mxu0 %vm557_vm1, %v692_v33  ;;  %967 = vmatmul.msk.f32.gmra.mxu1 %vm557_vm1, %v696_v31 }
 0x199   : > { %975 = vmatmul.msk.f32.gmra.mxu3 %vm557_vm1, %v704_v32 }
 0x19d   : > { %v668_v38 = vpop.permute.xlu0 %667  ;;  %v688_v39 = vpop.permute.xlu1 %687 }
 0x19e   : > { %v701_v41 = vmul.f32 %v668_v38, %v589_v36  ;;  %v705_v42 = vmul.f32 %v688_v39, %v593_v37 }
 0x1a0   : > { %964 = vmatmul.msk.f32.gmra.mxu0 %vm557_vm1, %v693_v40  ;;  %972 = vmatmul.msk.f32.gmra.mxu2 %vm557_vm1, %v701_v41 }
 0x1a1   : > { %976 = vmatmul.msk.f32.gmra.mxu3 %vm557_vm1, %v705_v42 }
 0x1a5   : > { %v648_v44 = vpop.permute.xlu0 %647 }
 0x1a6   : > { %v697_v45 = vmul.f32 %v648_v44, %v585_v43 }
 0x1a8   : > { %968 = vmatmul.msk.f32.gmra.mxu1 %vm557_vm1, %v697_v45 }
 0x1fd   : > { %v779_v47 = vpop.f32.mrf.mxu0 }
 0x1fe   : > { %v780_v48 = vadd.f32 %v1140_v46, %v779_v47 }
 0x200   : > { %827 = vst [vmem:[%s1325_s14] sm:$0xff] %v780_v48 }
 0x203   : > { %v803_v49 = vpop.f32.mrf.mxu2 }
 0x204   : > { %v804_v50 = vadd.f32 %v1140_v46, %v803_v49 }
 0x205   : > { %v791_v51 = vpop.f32.mrf.mxu1 }
 0x206   : > { %835 = vst [vmem:[%s1325_s14 + $0x40] sm:$0xff] %v804_v50  ;;  %v792_v52 = vadd.f32 %v1140_v46, %v791_v51 }
 0x208   : > { %831 = vst [vmem:[%s1325_s14 + $0x20] sm:$0xff] %v792_v52 }
 0x20b   : > { %v806_v53 = vpop.f32.mrf.mxu2 }
 0x20c   : > { %v807_v54 = vadd.f32 %v1140_v46, %v806_v53  ;;  %v815_v55 = vpop.f32.mrf.mxu3 }
 0x20d   : > { %v816_v56 = vadd.f32 %v1140_v46, %v815_v55  ;;  %v782_v57 = vpop.f32.mrf.mxu0  ;;  %v794_v58 = vpop.f32.mrf.mxu1 }
 0x20e   : > { %836 = vst [vmem:[%s1325_s14 + $0x48] sm:$0xff] %v807_v54  ;;  %v783_v59 = vadd.f32 %v1140_v46, %v782_v57  ;;  %v795_v60 = vadd.f32 %v1140_v46, %v794_v58 }
 0x20f   : > { %839 = vst [vmem:[%s1325_s14 + $0x60] sm:$0xff] %v816_v56 }
 0x210   : > { %828 = vst [vmem:[%s1325_s14 + $0x8] sm:$0xff] %v783_v59 }
 0x211   : > { %832 = vst [vmem:[%s1325_s14 + $0x28] sm:$0xff] %v795_v60 }
 0x214   : > { %v809_v61 = vpop.f32.mrf.mxu2  ;;  %v818_v62 = vpop.f32.mrf.mxu3 }
 0x215   : > { %v810_v63 = vadd.f32 %v1140_v46, %v809_v61  ;;  %v819_v0 = vadd.f32 %v1140_v46, %v818_v62  ;;  %v785_v1 = vpop.f32.mrf.mxu0  ;;  %v797_v2 = vpop.f32.mrf.mxu1 }
 0x216   : > { %v786_v3 = vadd.f32 %v1140_v46, %v785_v1  ;;  %v798_v4 = vadd.f32 %v1140_v46, %v797_v2 }
 0x217   : > { %837 = vst [vmem:[%s1325_s14 + $0x50] sm:$0xff] %v810_v63 }
 0x218   : > { %840 = vst [vmem:[%s1325_s14 + $0x68] sm:$0xff] %v819_v0 }
 0x219   : > { %829 = vst [vmem:[%s1325_s14 + $0x10] sm:$0xff] %v786_v3 }
 0x21a   : > { %833 = vst [vmem:[%s1325_s14 + $0x30] sm:$0xff] %v798_v4 }
 0x21c   : > { %v821_v5 = vpop.f32.mrf.mxu3 }
 0x21d   : > { %v822_v6 = vadd.f32 %v1140_v46, %v821_v5  ;;  %v788_v7 = vpop.f32.mrf.mxu0 }
 0x21e   : > { %v789_v8 = vadd.f32 %v1140_v46, %v788_v7 }
 0x21f   : > { %841 = vst [vmem:[%s1325_s14 + $0x70] sm:$0xff] %v822_v6 }
 0x220   : > { %830 = vst [vmem:[%s1325_s14 + $0x18] sm:$0xff] %v789_v8 }
 0x223   : > { %v812_v9 = vpop.f32.mrf.mxu2 }
 0x224   : > { %v813_v10 = vadd.f32 %v1140_v46, %v812_v9  ;;  %v824_v11 = vpop.f32.mrf.mxu3 }
 0x225   : > { %v825_v12 = vadd.f32 %v1140_v46, %v824_v11  ;;  %v800_v13 = vpop.f32.mrf.mxu1 }
 0x226   : > { %838 = vst [vmem:[%s1325_s14 + $0x58] sm:$0xff] %v813_v10  ;;  %v801_v14 = vadd.f32 %v1140_v46, %v800_v13 }
 0x227   : > { %842 = vst [vmem:[%s1325_s14 + $0x78] sm:$0xff] %v825_v12 }
 0x228   : > { %834 = vst [vmem:[%s1325_s14 + $0x38] sm:$0xff] %v801_v14 }
 0x229 PF: > { %s15_s24 = sadd.s32 1, %s1195_s24   ;;  %s1477_s18 = smov %s1175_s19 }
 0x22a   : > { %p12_p0 = scmp.ge.s32.totalorder %s15_s24, 6   ;;  %s1478_s19 = smov %s1280_s6 }
 0x22b   : > { %s1479_s20 = smov %s1187_s22  ;;  %s1480_s21 = smov %s1191_s23 }
 0x22c   : > { %s1481_s22 = smov %s1484_s25  ;;  %s1482_s23 = smov %s1488_s26 }
 0x22d   :  { %14 = sbr.rel (!%p12_p0) target bundleno = 4 (0x4), region = 130 }

</bundles_post_ra>
